<compile_context>
chip_gen: v5e
topology: v5e:2x2
jax: 0.10.0
libtpu: 0.0.40
codegen_flags: <defaults>
</compile_context>

<pallas_src>
import math
import functools

import jax
import jax.numpy as jnp
from jax import lax
from jax.experimental import pallas as pl
from jax.experimental.pallas import tpu as pltpu

# ---------------- "args" (synthetic, small) ----------------
PRED_DIM = 32            # args.pred_dim (d_model)
EMBED_DIM = 32           # args.embed_dim (must equal pred_dim)
N_HEADS = 4              # args.n_heads
N_LAYERS = 2             # args.n_layers -> encoder depth = n_layers // 2 = 1
MAX_SEQ_LEN = 16         # args.max_seq_len
FFN_DIM = PRED_DIM * 4
LN_EPS_PRE = 1e-12       # Aggregator.layer_norm eps
LN_EPS_ENC = 1e-5        # TransformerEncoderLayer default LayerNorm eps
NEG_INF = -1e9           # additive mask value (exp underflows to exactly 0 in f32)
# TODO(synk): dropout (p=args.dropout) is identity in eval mode; not implemented as a kernel.


# ---------------- helpers ----------------
def _layernorm(x, gamma, beta, eps):
    mu = jnp.mean(x, axis=-1, keepdims=True)
    var = jnp.mean((x - mu) ** 2, axis=-1, keepdims=True)
    return (x - mu) * lax.rsqrt(var + eps) * gamma + beta


# ---------------- fused Pallas kernel ----------------
def aggregator_kernel(x_ref, pe_ref, pre_g_ref, pre_b_ref, bias_ref,
                      wqkv_ref, bqkv_ref, wo_ref, bo_ref,
                      ln1_g_ref, ln1_b_ref,
                      w1_ref, b1_ref, w2_ref, b2_ref,
                      ln2_g_ref, ln2_b_ref,
                      o_ref, ctx_ref, *, n_heads, n_layers):
    D = x_ref.shape[-1]
    hd = D // n_heads
    scale = 1.0 / math.sqrt(hd)

    # positional encoding + pre LayerNorm (eps 1e-12); whole batch as (B*S, D)
    x = _layernorm(x_ref[...] + pe_ref[...], pre_g_ref[...], pre_b_ref[...], LN_EPS_PRE)
    bias = bias_ref[...]            # (BS, BS): block-diag batch mask + key padding

    for l in range(n_layers):       # static unroll over encoder layers
        # ---- multi-head self-attention (fused QKV projection) ----
        qkv = jnp.dot(x, wqkv_ref[l], preferred_element_type=jnp.float32) + bqkv_ref[l]
        for h in range(n_heads):    # static head loop, static lane slices
            q0, k0, v0 = h * hd, D + h * hd, 2 * D + h * hd
            qh = qkv[:, q0:q0 + hd] * scale
            kh = qkv[:, k0:k0 + hd]
            vh = qkv[:, v0:v0 + hd]
            # q . k^T without an explicit transpose (contract last dims of both)
            s = lax.dot_general(qh, kh, (((1,), (1,)), ((), ())),
                                preferred_element_type=jnp.float32) + bias
            s = s - jnp.max(s, axis=-1, keepdims=True)
            p = jnp.exp(s)
            p = p * pl.reciprocal(jnp.sum(p, axis=-1, keepdims=True), approx=True)
            # per-head context written into VMEM scratch at its lane slot
            ctx_ref[:, q0:q0 + hd] = jnp.dot(p, vh, preferred_element_type=jnp.float32)
        # single fat output projection over all heads
        attn = jnp.dot(ctx_ref[...], wo_ref[l], preferred_element_type=jnp.float32) + bo_ref[l]
        x = _layernorm(x + attn, ln1_g_ref[l], ln1_b_ref[l], LN_EPS_ENC)

        # ---- feed-forward (ReLU) ----
        hid = jnp.dot(x, w1_ref[l], preferred_element_type=jnp.float32) + b1_ref[l]
        hid = jnp.maximum(hid, 0.0)
        y = jnp.dot(hid, w2_ref[l], preferred_element_type=jnp.float32) + b2_ref[l]
        x = _layernorm(x + y, ln2_g_ref[l], ln2_b_ref[l], LN_EPS_ENC)

    o_ref[...] = x.astype(o_ref.dtype)


# ---------------- wrapper (single pallas_call for the whole forward) ----------------
@jax.jit
def aggregator_forward(params, events, input_ids):
    B, S, D = events.shape
    BS = B * S

    # key padding: True where input_ids[:, :, 1] == 0
    pad = (input_ids[:, :, 1] == 0).reshape(BS)
    batch_ids = jnp.repeat(jnp.arange(B, dtype=jnp.int32), S)            # (BS,)
    same_batch = batch_ids[:, None] == batch_ids[None, :]                # (BS, BS)
    # additive bias: 0 for (same batch, unpadded key), -1e9 otherwise
    bias = jnp.where(same_batch & (~pad)[None, :], 0.0, NEG_INF).astype(jnp.float32)

    x_flat = events.reshape(BS, D)
    pe_b = jnp.broadcast_to(params["pe"][:S][None], (B, S, D)).reshape(BS, D)

    L = params["wqkv"].shape[0]
    vmem = pl.BlockSpec(memory_space=pltpu.MemorySpace.VMEM)

    out_flat = pl.pallas_call(
        functools.partial(aggregator_kernel, n_heads=N_HEADS, n_layers=L),
        out_shape=jax.ShapeDtypeStruct((BS, D), events.dtype),
        in_specs=[vmem] * 17,
        out_specs=vmem,
        scratch_shapes=[pltpu.VMEM((BS, D), jnp.float32)],   # per-head context buffer
    )(x_flat, pe_b, params["pre_ln_g"], params["pre_ln_b"], bias,
      params["wqkv"], params["bqkv"], params["wo"], params["bo"],
      params["ln1_g"], params["ln1_b"],
      params["w1"], params["b1"], params["w2"], params["b2"],
      params["ln2_g"], params["ln2_b"])
    return out_flat.reshape(B, S, D)


# ---------------- parameters ----------------
def make_positional_encoding(max_len, d_model):
    position = jnp.arange(max_len, dtype=jnp.float32)[:, None]
    div_term = jnp.exp(jnp.arange(0, d_model, 2, dtype=jnp.float32)
                       * (-math.log(10000.0) / d_model))
    pe = jnp.zeros((max_len, d_model), dtype=jnp.float32)
    pe = pe.at[:, 0::2].set(jnp.sin(position * div_term))
    pe = pe.at[:, 1::2].set(jnp.cos(position * div_term))
    return pe


def init_params(key):
    D, F = PRED_DIM, FFN_DIM
    L = N_LAYERS // 2

    def w(k, shape, scale=0.05):
        return scale * jax.random.normal(k, shape, dtype=jnp.float32)

    keys = jax.random.split(key, 6)
    return {
        "pe": make_positional_encoding(MAX_SEQ_LEN, D),
        "pre_ln_g": jnp.ones((1, EMBED_DIM), jnp.float32),
        "pre_ln_b": jnp.zeros((1, EMBED_DIM), jnp.float32),
        # stacked per-layer weights, "x @ W" orientation
        "wqkv": w(keys[0], (L, D, 3 * D)),
        "bqkv": w(keys[1], (L, 1, 3 * D), 0.01),
        "wo": w(keys[2], (L, D, D)),
        "bo": w(keys[3], (L, 1, D), 0.01),
        "w1": w(keys[4], (L, D, F)),
        "b1": jnp.zeros((L, 1, F), jnp.float32),
        "w2": w(keys[5], (L, F, D)),
        "b2": jnp.zeros((L, 1, D), jnp.float32),
        "ln1_g": jnp.ones((L, 1, D), jnp.float32),
        "ln1_b": jnp.zeros((L, 1, D), jnp.float32),
        "ln2_g": jnp.ones((L, 1, D), jnp.float32),
        "ln2_b": jnp.zeros((L, 1, D), jnp.float32),
    }


# ---------------- pure-JAX reference (sanity check) ----------------
def aggregator_reference(params, events, input_ids):
    B, S, D = events.shape
    H, hd = N_HEADS, D // N_HEADS
    pad = (input_ids[:, :, 1] == 0)
    bias = jnp.where(pad, NEG_INF, 0.0)[:, None, None, :]       # (B,1,1,S)

    x = events + params["pe"][:S][None]
    x = _layernorm(x, params["pre_ln_g"], params["pre_ln_b"], LN_EPS_PRE)

    L = params["wqkv"].shape[0]
    for l in range(L):
        qkv = x @ params["wqkv"][l] + params["bqkv"][l]
        q, k, v = jnp.split(qkv, 3, axis=-1)
        q = q.reshape(B, S, H, hd).transpose(0, 2, 1, 3) / math.sqrt(hd)
        k = k.reshape(B, S, H, hd).transpose(0, 2, 1, 3)
        v = v.reshape(B, S, H, hd).transpose(0, 2, 1, 3)
        s = jnp.einsum("bhqd,bhkd->bhqk", q, k) + bias
        p = jax.nn.softmax(s, axis=-1)
        ctx = jnp.einsum("bhqk,bhkd->bhqd", p, v).transpose(0, 2, 1, 3).reshape(B, S, D)
        attn = ctx @ params["wo"][l] + params["bo"][l]
        x = _layernorm(x + attn, params["ln1_g"][l], params["ln1_b"][l], LN_EPS_ENC)
        hid = jax.nn.relu(x @ params["w1"][l] + params["b1"][l])
        y = hid @ params["w2"][l] + params["b2"][l]
        x = _layernorm(x + y, params["ln2_g"][l], params["ln2_b"][l], LN_EPS_ENC)
    return x


if __name__ == "__main__":
    B, S, D = 2, 8, PRED_DIM

    key = jax.random.PRNGKey(0)
    k_ev, k_id, k_par = jax.random.split(key, 3)

    events = jax.random.normal(k_ev, (B, S, D), dtype=jnp.float32)
    input_ids = jax.random.randint(k_id, (B, S, 2), 1, 100, dtype=jnp.int32)
    # create some padded positions (input_ids[:, :, 1] == 0)
    input_ids = input_ids.at[0, 6:, 1].set(0)
    input_ids = input_ids.at[1, 5:, 1].set(0)

    params = init_params(k_par)

    out = aggregator_forward(params, events, input_ids)
    out = jax.block_until_ready(out)
    assert out.shape == (B, S, D)
    assert bool(jnp.all(jnp.isfinite(out)))

    ref = aggregator_reference(params, events, input_ids)
    max_err = float(jnp.max(jnp.abs(out - ref)))
    assert max_err < 2e-2, f"max abs diff vs reference too large: {max_err}"

    print("KERNEL_OK")
</pallas_src>

<mosaic_0001>
module attributes {stable_mosaic.version = 11 : i64} {
  func.func @aggregator_kernel(%arg0: memref<16x32xf32, #tpu.memory_space<vmem>>, %arg1: memref<16x32xf32, #tpu.memory_space<vmem>>, %arg2: memref<1x32xf32, #tpu.memory_space<vmem>>, %arg3: memref<1x32xf32, #tpu.memory_space<vmem>>, %arg4: memref<16x16xf32, #tpu.memory_space<vmem>>, %arg5: memref<1x32x96xf32, #tpu.memory_space<vmem>>, %arg6: memref<1x1x96xf32, #tpu.memory_space<vmem>>, %arg7: memref<1x32x32xf32, #tpu.memory_space<vmem>>, %arg8: memref<1x1x32xf32, #tpu.memory_space<vmem>>, %arg9: memref<1x1x32xf32, #tpu.memory_space<vmem>>, %arg10: memref<1x1x32xf32, #tpu.memory_space<vmem>>, %arg11: memref<1x32x128xf32, #tpu.memory_space<vmem>>, %arg12: memref<1x1x128xf32, #tpu.memory_space<vmem>>, %arg13: memref<1x128x32xf32, #tpu.memory_space<vmem>>, %arg14: memref<1x1x32xf32, #tpu.memory_space<vmem>>, %arg15: memref<1x1x32xf32, #tpu.memory_space<vmem>>, %arg16: memref<1x1x32xf32, #tpu.memory_space<vmem>>, %arg17: memref<16x32xf32, #tpu.memory_space<vmem>>, %arg18: memref<16x32xf32, #tpu.memory_space<vmem>>) attributes {dimension_semantics = [], scalar_prefetch = 0 : i64, scratch_operands = 1 : i64, tpu.core_type = #tpu.core_type<tc>} {
    %c0 = arith.constant 0 : index
    %c0_0 = arith.constant 0 : index
    %0 = vector.load %arg0[%c0, %c0_0] : memref<16x32xf32, #tpu.memory_space<vmem>>, vector<16x32xf32>
    %c0_1 = arith.constant 0 : index
    %c0_2 = arith.constant 0 : index
    %1 = vector.load %arg1[%c0_1, %c0_2] : memref<16x32xf32, #tpu.memory_space<vmem>>, vector<16x32xf32>
    %2 = arith.addf %0, %1 : vector<16x32xf32>
    %c0_3 = arith.constant 0 : index
    %c0_4 = arith.constant 0 : index
    %3 = vector.load %arg2[%c0_3, %c0_4] : memref<1x32xf32, #tpu.memory_space<vmem>>, vector<1x32xf32>
    %c0_5 = arith.constant 0 : index
    %c0_6 = arith.constant 0 : index
    %4 = vector.load %arg3[%c0_5, %c0_6] : memref<1x32xf32, #tpu.memory_space<vmem>>, vector<1x32xf32>
    %cst = arith.constant dense<0.000000e+00> : vector<16xf32>
    %5 = vector.multi_reduction <add>, %2, %cst [1] : vector<16x32xf32> to vector<16xf32>
    %6 = vector.shape_cast %5 : vector<16xf32> to vector<16x1xf32>
    %cst_7 = arith.constant 3.200000e+01 : f32
    %7 = vector.broadcast %cst_7 : f32 to vector<16x1xf32>
    %8 = arith.divf %6, %7 : vector<16x1xf32>
    %9 = vector.broadcast %8 : vector<16x1xf32> to vector<16x32xf32>
    %10 = arith.subf %2, %9 : vector<16x32xf32>
    %11 = arith.mulf %10, %10 : vector<16x32xf32>
    %cst_8 = arith.constant dense<0.000000e+00> : vector<16xf32>
    %12 = vector.multi_reduction <add>, %11, %cst_8 [1] : vector<16x32xf32> to vector<16xf32>
    %13 = vector.shape_cast %12 : vector<16xf32> to vector<16x1xf32>
    %cst_9 = arith.constant 3.200000e+01 : f32
    %14 = vector.broadcast %cst_9 : f32 to vector<16x1xf32>
    %15 = arith.divf %13, %14 : vector<16x1xf32>
    %16 = vector.broadcast %8 : vector<16x1xf32> to vector<16x32xf32>
    %17 = arith.subf %2, %16 : vector<16x32xf32>
    %cst_10 = arith.constant 9.99999996E-13 : f32
    %18 = vector.broadcast %cst_10 : f32 to vector<16x1xf32>
    %19 = arith.addf %15, %18 : vector<16x1xf32>
    %20 = math.rsqrt %19 : vector<16x1xf32>
    %21 = vector.broadcast %20 : vector<16x1xf32> to vector<16x32xf32>
    %22 = arith.mulf %17, %21 : vector<16x32xf32>
    %23 = vector.broadcast %3 : vector<1x32xf32> to vector<16x32xf32>
    %24 = arith.mulf %22, %23 : vector<16x32xf32>
    %25 = vector.broadcast %4 : vector<1x32xf32> to vector<16x32xf32>
    %26 = arith.addf %24, %25 : vector<16x32xf32>
    %c0_11 = arith.constant 0 : index
    %c0_12 = arith.constant 0 : index
    %27 = vector.load %arg4[%c0_11, %c0_12] : memref<16x16xf32, #tpu.memory_space<vmem>>, vector<16x16xf32>
    %c0_13 = arith.constant 0 : index
    %c0_14 = arith.constant 0 : index
    %c0_15 = arith.constant 0 : index
    %28 = vector.load %arg5[%c0_13, %c0_14, %c0_15] : memref<1x32x96xf32, #tpu.memory_space<vmem>>, vector<1x32x96xf32>
    %29 = vector.shape_cast %28 : vector<1x32x96xf32> to vector<32x96xf32>
    %cst_16 = arith.constant dense<0.000000e+00> : vector<16x96xf32>
    %30 = tpu.matmul %26, %29, %cst_16 {dimension_numbers = #tpu.dot_dimension_numbers<[1], [0], [0], [1], [0, 0, 1, 1], [], []>} : vector<16x32xf32>, vector<32x96xf32>, vector<16x96xf32> -> vector<16x96xf32>
    %c0_17 = arith.constant 0 : index
    %c0_18 = arith.constant 0 : index
    %c0_19 = arith.constant 0 : index
    %31 = vector.load %arg6[%c0_17, %c0_18, %c0_19] : memref<1x1x96xf32, #tpu.memory_space<vmem>>, vector<1x1x96xf32>
    %32 = vector.shape_cast %31 : vector<1x1x96xf32> to vector<1x96xf32>
    %33 = vector.broadcast %32 : vector<1x96xf32> to vector<16x96xf32>
    %34 = arith.addf %30, %33 : vector<16x96xf32>
    %35 = vector.extract_strided_slice %34 {offsets = [0, 0], sizes = [16, 8], strides = [1, 1]} : vector<16x96xf32> to vector<16x8xf32>
    %cst_20 = arith.constant 0.353553385 : f32
    %36 = vector.broadcast %cst_20 : f32 to vector<16x8xf32>
    %37 = arith.mulf %35, %36 : vector<16x8xf32>
    %38 = vector.extract_strided_slice %34 {offsets = [0, 32], sizes = [16, 8], strides = [1, 1]} : vector<16x96xf32> to vector<16x8xf32>
    %39 = vector.extract_strided_slice %34 {offsets = [0, 64], sizes = [16, 8], strides = [1, 1]} : vector<16x96xf32> to vector<16x8xf32>
    %cst_21 = arith.constant dense<0.000000e+00> : vector<16x16xf32>
    %40 = tpu.matmul %37, %38, %cst_21 {dimension_numbers = #tpu.dot_dimension_numbers<[1], [1], [0], [0], [0, 0, 1, 0], [], []>} : vector<16x8xf32>, vector<16x8xf32>, vector<16x16xf32> -> vector<16x16xf32>
    %41 = arith.addf %40, %27 : vector<16x16xf32>
    %cst_22 = arith.constant dense<0xFF800000> : vector<16xf32>
    %42 = vector.multi_reduction <maximumf>, %41, %cst_22 [1] : vector<16x16xf32> to vector<16xf32>
    %43 = vector.shape_cast %42 : vector<16xf32> to vector<16x1xf32>
    %44 = vector.broadcast %43 : vector<16x1xf32> to vector<16x16xf32>
    %45 = arith.subf %41, %44 : vector<16x16xf32>
    %46 = math.exp %45 : vector<16x16xf32>
    %cst_23 = arith.constant dense<0.000000e+00> : vector<16xf32>
    %47 = vector.multi_reduction <add>, %46, %cst_23 [1] : vector<16x16xf32> to vector<16xf32>
    %48 = vector.shape_cast %47 : vector<16xf32> to vector<16x1xf32>
    %49 = tpu.reciprocal %48 {approx = true} : vector<16x1xf32> -> vector<16x1xf32>
    %50 = vector.broadcast %49 : vector<16x1xf32> to vector<16x16xf32>
    %51 = arith.mulf %46, %50 : vector<16x16xf32>
    %cst_24 = arith.constant dense<0.000000e+00> : vector<16x8xf32>
    %52 = tpu.matmul %51, %39, %cst_24 {dimension_numbers = #tpu.dot_dimension_numbers<[1], [0], [0], [1], [0, 0, 1, 1], [], []>} : vector<16x16xf32>, vector<16x8xf32>, vector<16x8xf32> -> vector<16x8xf32>
    %c0_25 = arith.constant 0 : index
    %c0_26 = arith.constant 0 : index
    %53 = vector.load %arg18[%c0_25, %c0_26] : memref<16x32xf32, #tpu.memory_space<vmem>>, vector<16x8xf32>
    tpu.vector_store %arg18[%c0_25, %c0_26], %52 {strides = array<i32>} : memref<16x32xf32, #tpu.memory_space<vmem>>, vector<16x8xf32>,
    %54 = vector.extract_strided_slice %34 {offsets = [0, 8], sizes = [16, 8], strides = [1, 1]} : vector<16x96xf32> to vector<16x8xf32>
    %cst_27 = arith.constant 0.353553385 : f32
    %55 = vector.broadcast %cst_27 : f32 to vector<16x8xf32>
    %56 = arith.mulf %54, %55 : vector<16x8xf32>
    %57 = vector.extract_strided_slice %34 {offsets = [0, 40], sizes = [16, 8], strides = [1, 1]} : vector<16x96xf32> to vector<16x8xf32>
    %58 = vector.extract_strided_slice %34 {offsets = [0, 72], sizes = [16, 8], strides = [1, 1]} : vector<16x96xf32> to vector<16x8xf32>
    %cst_28 = arith.constant dense<0.000000e+00> : vector<16x16xf32>
    %59 = tpu.matmul %56, %57, %cst_28 {dimension_numbers = #tpu.dot_dimension_numbers<[1], [1], [0], [0], [0, 0, 1, 0], [], []>} : vector<16x8xf32>, vector<16x8xf32>, vector<16x16xf32> -> vector<16x16xf32>
    %60 = arith.addf %59, %27 : vector<16x16xf32>
    %cst_29 = arith.constant dense<0xFF800000> : vector<16xf32>
    %61 = vector.multi_reduction <maximumf>, %60, %cst_29 [1] : vector<16x16xf32> to vector<16xf32>
    %62 = vector.shape_cast %61 : vector<16xf32> to vector<16x1xf32>
    %63 = vector.broadcast %62 : vector<16x1xf32> to vector<16x16xf32>
    %64 = arith.subf %60, %63 : vector<16x16xf32>
    %65 = math.exp %64 : vector<16x16xf32>
    %cst_30 = arith.constant dense<0.000000e+00> : vector<16xf32>
    %66 = vector.multi_reduction <add>, %65, %cst_30 [1] : vector<16x16xf32> to vector<16xf32>
    %67 = vector.shape_cast %66 : vector<16xf32> to vector<16x1xf32>
    %68 = tpu.reciprocal %67 {approx = true} : vector<16x1xf32> -> vector<16x1xf32>
    %69 = vector.broadcast %68 : vector<16x1xf32> to vector<16x16xf32>
    %70 = arith.mulf %65, %69 : vector<16x16xf32>
    %cst_31 = arith.constant dense<0.000000e+00> : vector<16x8xf32>
    %71 = tpu.matmul %70, %58, %cst_31 {dimension_numbers = #tpu.dot_dimension_numbers<[1], [0], [0], [1], [0, 0, 1, 1], [], []>} : vector<16x16xf32>, vector<16x8xf32>, vector<16x8xf32> -> vector<16x8xf32>
    %c0_32 = arith.constant 0 : index
    %c8 = arith.constant 8 : index
    %72 = vector.load %arg18[%c0_32, %c8] : memref<16x32xf32, #tpu.memory_space<vmem>>, vector<16x8xf32>
    tpu.vector_store %arg18[%c0_32, %c8], %71 {strides = array<i32>} : memref<16x32xf32, #tpu.memory_space<vmem>>, vector<16x8xf32>,
    %73 = vector.extract_strided_slice %34 {offsets = [0, 16], sizes = [16, 8], strides = [1, 1]} : vector<16x96xf32> to vector<16x8xf32>
    %cst_33 = arith.constant 0.353553385 : f32
    %74 = vector.broadcast %cst_33 : f32 to vector<16x8xf32>
    %75 = arith.mulf %73, %74 : vector<16x8xf32>
    %76 = vector.extract_strided_slice %34 {offsets = [0, 48], sizes = [16, 8], strides = [1, 1]} : vector<16x96xf32> to vector<16x8xf32>
    %77 = vector.extract_strided_slice %34 {offsets = [0, 80], sizes = [16, 8], strides = [1, 1]} : vector<16x96xf32> to vector<16x8xf32>
    %cst_34 = arith.constant dense<0.000000e+00> : vector<16x16xf32>
    %78 = tpu.matmul %75, %76, %cst_34 {dimension_numbers = #tpu.dot_dimension_numbers<[1], [1], [0], [0], [0, 0, 1, 0], [], []>} : vector<16x8xf32>, vector<16x8xf32>, vector<16x16xf32> -> vector<16x16xf32>
    %79 = arith.addf %78, %27 : vector<16x16xf32>
    %cst_35 = arith.constant dense<0xFF800000> : vector<16xf32>
    %80 = vector.multi_reduction <maximumf>, %79, %cst_35 [1] : vector<16x16xf32> to vector<16xf32>
    %81 = vector.shape_cast %80 : vector<16xf32> to vector<16x1xf32>
    %82 = vector.broadcast %81 : vector<16x1xf32> to vector<16x16xf32>
    %83 = arith.subf %79, %82 : vector<16x16xf32>
    %84 = math.exp %83 : vector<16x16xf32>
    %cst_36 = arith.constant dense<0.000000e+00> : vector<16xf32>
    %85 = vector.multi_reduction <add>, %84, %cst_36 [1] : vector<16x16xf32> to vector<16xf32>
    %86 = vector.shape_cast %85 : vector<16xf32> to vector<16x1xf32>
    %87 = tpu.reciprocal %86 {approx = true} : vector<16x1xf32> -> vector<16x1xf32>
    %88 = vector.broadcast %87 : vector<16x1xf32> to vector<16x16xf32>
    %89 = arith.mulf %84, %88 : vector<16x16xf32>
    %cst_37 = arith.constant dense<0.000000e+00> : vector<16x8xf32>
    %90 = tpu.matmul %89, %77, %cst_37 {dimension_numbers = #tpu.dot_dimension_numbers<[1], [0], [0], [1], [0, 0, 1, 1], [], []>} : vector<16x16xf32>, vector<16x8xf32>, vector<16x8xf32> -> vector<16x8xf32>
    %c0_38 = arith.constant 0 : index
    %c16 = arith.constant 16 : index
    %91 = vector.load %arg18[%c0_38, %c16] : memref<16x32xf32, #tpu.memory_space<vmem>>, vector<16x8xf32>
    tpu.vector_store %arg18[%c0_38, %c16], %90 {strides = array<i32>} : memref<16x32xf32, #tpu.memory_space<vmem>>, vector<16x8xf32>,
    %92 = vector.extract_strided_slice %34 {offsets = [0, 24], sizes = [16, 8], strides = [1, 1]} : vector<16x96xf32> to vector<16x8xf32>
    %cst_39 = arith.constant 0.353553385 : f32
    %93 = vector.broadcast %cst_39 : f32 to vector<16x8xf32>
    %94 = arith.mulf %92, %93 : vector<16x8xf32>
    %95 = vector.extract_strided_slice %34 {offsets = [0, 56], sizes = [16, 8], strides = [1, 1]} : vector<16x96xf32> to vector<16x8xf32>
    %96 = vector.extract_strided_slice %34 {offsets = [0, 88], sizes = [16, 8], strides = [1, 1]} : vector<16x96xf32> to vector<16x8xf32>
    %cst_40 = arith.constant dense<0.000000e+00> : vector<16x16xf32>
    %97 = tpu.matmul %94, %95, %cst_40 {dimension_numbers = #tpu.dot_dimension_numbers<[1], [1], [0], [0], [0, 0, 1, 0], [], []>} : vector<16x8xf32>, vector<16x8xf32>, vector<16x16xf32> -> vector<16x16xf32>
    %98 = arith.addf %97, %27 : vector<16x16xf32>
    %cst_41 = arith.constant dense<0xFF800000> : vector<16xf32>
    %99 = vector.multi_reduction <maximumf>, %98, %cst_41 [1] : vector<16x16xf32> to vector<16xf32>
    %100 = vector.shape_cast %99 : vector<16xf32> to vector<16x1xf32>
    %101 = vector.broadcast %100 : vector<16x1xf32> to vector<16x16xf32>
    %102 = arith.subf %98, %101 : vector<16x16xf32>
    %103 = math.exp %102 : vector<16x16xf32>
    %cst_42 = arith.constant dense<0.000000e+00> : vector<16xf32>
    %104 = vector.multi_reduction <add>, %103, %cst_42 [1] : vector<16x16xf32> to vector<16xf32>
    %105 = vector.shape_cast %104 : vector<16xf32> to vector<16x1xf32>
    %106 = tpu.reciprocal %105 {approx = true} : vector<16x1xf32> -> vector<16x1xf32>
    %107 = vector.broadcast %106 : vector<16x1xf32> to vector<16x16xf32>
    %108 = arith.mulf %103, %107 : vector<16x16xf32>
    %cst_43 = arith.constant dense<0.000000e+00> : vector<16x8xf32>
    %109 = tpu.matmul %108, %96, %cst_43 {dimension_numbers = #tpu.dot_dimension_numbers<[1], [0], [0], [1], [0, 0, 1, 1], [], []>} : vector<16x16xf32>, vector<16x8xf32>, vector<16x8xf32> -> vector<16x8xf32>
    %c0_44 = arith.constant 0 : index
    %c24 = arith.constant 24 : index
    %110 = vector.load %arg18[%c0_44, %c24] : memref<16x32xf32, #tpu.memory_space<vmem>>, vector<16x8xf32>
    tpu.vector_store %arg18[%c0_44, %c24], %109 {strides = array<i32>} : memref<16x32xf32, #tpu.memory_space<vmem>>, vector<16x8xf32>,
    %c0_45 = arith.constant 0 : index
    %c0_46 = arith.constant 0 : index
    %111 = vector.load %arg18[%c0_45, %c0_46] : memref<16x32xf32, #tpu.memory_space<vmem>>, vector<16x32xf32>
    %c0_47 = arith.constant 0 : index
    %c0_48 = arith.constant 0 : index
    %c0_49 = arith.constant 0 : index
    %112 = vector.load %arg7[%c0_47, %c0_48, %c0_49] : memref<1x32x32xf32, #tpu.memory_space<vmem>>, vector<1x32x32xf32>
    %113 = vector.shape_cast %112 : vector<1x32x32xf32> to vector<32x32xf32>
    %cst_50 = arith.constant dense<0.000000e+00> : vector<16x32xf32>
    %114 = tpu.matmul %111, %113, %cst_50 {dimension_numbers = #tpu.dot_dimension_numbers<[1], [0], [0], [1], [0, 0, 1, 1], [], []>} : vector<16x32xf32>, vector<32x32xf32>, vector<16x32xf32> -> vector<16x32xf32>
    %c0_51 = arith.constant 0 : index
    %c0_52 = arith.constant 0 : index
    %c0_53 = arith.constant 0 : index
    %115 = vector.load %arg8[%c0_51, %c0_52, %c0_53] : memref<1x1x32xf32, #tpu.memory_space<vmem>>, vector<1x1x32xf32>
    %116 = vector.shape_cast %115 : vector<1x1x32xf32> to vector<1x32xf32>
    %117 = vector.broadcast %116 : vector<1x32xf32> to vector<16x32xf32>
    %118 = arith.addf %114, %117 : vector<16x32xf32>
    %119 = arith.addf %26, %118 : vector<16x32xf32>
    %c0_54 = arith.constant 0 : index
    %c0_55 = arith.constant 0 : index
    %c0_56 = arith.constant 0 : index
    %120 = vector.load %arg9[%c0_54, %c0_55, %c0_56] : memref<1x1x32xf32, #tpu.memory_space<vmem>>, vector<1x1x32xf32>
    %121 = vector.shape_cast %120 : vector<1x1x32xf32> to vector<1x32xf32>
    %c0_57 = arith.constant 0 : index
    %c0_58 = arith.constant 0 : index
    %c0_59 = arith.constant 0 : index
    %122 = vector.load %arg10[%c0_57, %c0_58, %c0_59] : memref<1x1x32xf32, #tpu.memory_space<vmem>>, vector<1x1x32xf32>
    %123 = vector.shape_cast %122 : vector<1x1x32xf32> to vector<1x32xf32>
    %cst_60 = arith.constant dense<0.000000e+00> : vector<16xf32>
    %124 = vector.multi_reduction <add>, %119, %cst_60 [1] : vector<16x32xf32> to vector<16xf32>
    %125 = vector.shape_cast %124 : vector<16xf32> to vector<16x1xf32>
    %cst_61 = arith.constant 3.200000e+01 : f32
    %126 = vector.broadcast %cst_61 : f32 to vector<16x1xf32>
    %127 = arith.divf %125, %126 : vector<16x1xf32>
    %128 = vector.broadcast %127 : vector<16x1xf32> to vector<16x32xf32>
    %129 = arith.subf %119, %128 : vector<16x32xf32>
    %130 = arith.mulf %129, %129 : vector<16x32xf32>
    %cst_62 = arith.constant dense<0.000000e+00> : vector<16xf32>
    %131 = vector.multi_reduction <add>, %130, %cst_62 [1] : vector<16x32xf32> to vector<16xf32>
    %132 = vector.shape_cast %131 : vector<16xf32> to vector<16x1xf32>
    %cst_63 = arith.constant 3.200000e+01 : f32
    %133 = vector.broadcast %cst_63 : f32 to vector<16x1xf32>
    %134 = arith.divf %132, %133 : vector<16x1xf32>
    %135 = vector.broadcast %127 : vector<16x1xf32> to vector<16x32xf32>
    %136 = arith.subf %119, %135 : vector<16x32xf32>
    %cst_64 = arith.constant 9.99999974E-6 : f32
    %137 = vector.broadcast %cst_64 : f32 to vector<16x1xf32>
    %138 = arith.addf %134, %137 : vector<16x1xf32>
    %139 = math.rsqrt %138 : vector<16x1xf32>
    %140 = vector.broadcast %139 : vector<16x1xf32> to vector<16x32xf32>
    %141 = arith.mulf %136, %140 : vector<16x32xf32>
    %142 = vector.broadcast %121 : vector<1x32xf32> to vector<16x32xf32>
    %143 = arith.mulf %141, %142 : vector<16x32xf32>
    %144 = vector.broadcast %123 : vector<1x32xf32> to vector<16x32xf32>
    %145 = arith.addf %143, %144 : vector<16x32xf32>
    %c0_65 = arith.constant 0 : index
    %c0_66 = arith.constant 0 : index
    %c0_67 = arith.constant 0 : index
    %146 = vector.load %arg11[%c0_65, %c0_66, %c0_67] : memref<1x32x128xf32, #tpu.memory_space<vmem>>, vector<1x32x128xf32>
    %147 = vector.shape_cast %146 : vector<1x32x128xf32> to vector<32x128xf32>
    %cst_68 = arith.constant dense<0.000000e+00> : vector<16x128xf32>
    %148 = tpu.matmul %145, %147, %cst_68 {dimension_numbers = #tpu.dot_dimension_numbers<[1], [0], [0], [1], [0, 0, 1, 1], [], []>} : vector<16x32xf32>, vector<32x128xf32>, vector<16x128xf32> -> vector<16x128xf32>
    %c0_69 = arith.constant 0 : index
    %c0_70 = arith.constant 0 : index
    %c0_71 = arith.constant 0 : index
    %149 = vector.load %arg12[%c0_69, %c0_70, %c0_71] : memref<1x1x128xf32, #tpu.memory_space<vmem>>, vector<1x1x128xf32>
    %150 = vector.shape_cast %149 : vector<1x1x128xf32> to vector<1x128xf32>
    %151 = vector.broadcast %150 : vector<1x128xf32> to vector<16x128xf32>
    %152 = arith.addf %148, %151 : vector<16x128xf32>
    %cst_72 = arith.constant 0.000000e+00 : f32
    %153 = vector.broadcast %cst_72 : f32 to vector<16x128xf32>
    %154 = arith.maximumf %152, %153 : vector<16x128xf32>
    %c0_73 = arith.constant 0 : index
    %c0_74 = arith.constant 0 : index
    %c0_75 = arith.constant 0 : index
    %155 = vector.load %arg13[%c0_73, %c0_74, %c0_75] : memref<1x128x32xf32, #tpu.memory_space<vmem>>, vector<1x128x32xf32>
    %156 = vector.shape_cast %155 : vector<1x128x32xf32> to vector<128x32xf32>
    %cst_76 = arith.constant dense<0.000000e+00> : vector<16x32xf32>
    %157 = tpu.matmul %154, %156, %cst_76 {dimension_numbers = #tpu.dot_dimension_numbers<[1], [0], [0], [1], [0, 0, 1, 1], [], []>} : vector<16x128xf32>, vector<128x32xf32>, vector<16x32xf32> -> vector<16x32xf32>
    %c0_77 = arith.constant 0 : index
    %c0_78 = arith.constant 0 : index
    %c0_79 = arith.constant 0 : index
    %158 = vector.load %arg14[%c0_77, %c0_78, %c0_79] : memref<1x1x32xf32, #tpu.memory_space<vmem>>, vector<1x1x32xf32>
    %159 = vector.shape_cast %158 : vector<1x1x32xf32> to vector<1x32xf32>
    %160 = vector.broadcast %159 : vector<1x32xf32> to vector<16x32xf32>
    %161 = arith.addf %157, %160 : vector<16x32xf32>
    %162 = arith.addf %145, %161 : vector<16x32xf32>
    %c0_80 = arith.constant 0 : index
    %c0_81 = arith.constant 0 : index
    %c0_82 = arith.constant 0 : index
    %163 = vector.load %arg15[%c0_80, %c0_81, %c0_82] : memref<1x1x32xf32, #tpu.memory_space<vmem>>, vector<1x1x32xf32>
    %164 = vector.shape_cast %163 : vector<1x1x32xf32> to vector<1x32xf32>
    %c0_83 = arith.constant 0 : index
    %c0_84 = arith.constant 0 : index
    %c0_85 = arith.constant 0 : index
    %165 = vector.load %arg16[%c0_83, %c0_84, %c0_85] : memref<1x1x32xf32, #tpu.memory_space<vmem>>, vector<1x1x32xf32>
    %166 = vector.shape_cast %165 : vector<1x1x32xf32> to vector<1x32xf32>
    %cst_86 = arith.constant dense<0.000000e+00> : vector<16xf32>
    %167 = vector.multi_reduction <add>, %162, %cst_86 [1] : vector<16x32xf32> to vector<16xf32>
    %168 = vector.shape_cast %167 : vector<16xf32> to vector<16x1xf32>
    %cst_87 = arith.constant 3.200000e+01 : f32
    %169 = vector.broadcast %cst_87 : f32 to vector<16x1xf32>
    %170 = arith.divf %168, %169 : vector<16x1xf32>
    %171 = vector.broadcast %170 : vector<16x1xf32> to vector<16x32xf32>
    %172 = arith.subf %162, %171 : vector<16x32xf32>
    %173 = arith.mulf %172, %172 : vector<16x32xf32>
    %cst_88 = arith.constant dense<0.000000e+00> : vector<16xf32>
    %174 = vector.multi_reduction <add>, %173, %cst_88 [1] : vector<16x32xf32> to vector<16xf32>
    %175 = vector.shape_cast %174 : vector<16xf32> to vector<16x1xf32>
    %cst_89 = arith.constant 3.200000e+01 : f32
    %176 = vector.broadcast %cst_89 : f32 to vector<16x1xf32>
    %177 = arith.divf %175, %176 : vector<16x1xf32>
    %178 = vector.broadcast %170 : vector<16x1xf32> to vector<16x32xf32>
    %179 = arith.subf %162, %178 : vector<16x32xf32>
    %cst_90 = arith.constant 9.99999974E-6 : f32
    %180 = vector.broadcast %cst_90 : f32 to vector<16x1xf32>
    %181 = arith.addf %177, %180 : vector<16x1xf32>
    %182 = math.rsqrt %181 : vector<16x1xf32>
    %183 = vector.broadcast %182 : vector<16x1xf32> to vector<16x32xf32>
    %184 = arith.mulf %179, %183 : vector<16x32xf32>
    %185 = vector.broadcast %164 : vector<1x32xf32> to vector<16x32xf32>
    %186 = arith.mulf %184, %185 : vector<16x32xf32>
    %187 = vector.broadcast %166 : vector<1x32xf32> to vector<16x32xf32>
    %188 = arith.addf %186, %187 : vector<16x32xf32>
    %c0_91 = arith.constant 0 : index
    %c0_92 = arith.constant 0 : index
    %189 = vector.load %arg17[%c0_91, %c0_92] : memref<16x32xf32, #tpu.memory_space<vmem>>, vector<16x32xf32>
    tpu.vector_store %arg17[%c0_91, %c0_92], %188 {strides = array<i32>} : memref<16x32xf32, #tpu.memory_space<vmem>>, vector<16x32xf32>,
    return
  }
}

</mosaic_0001>

<bundles_post_ra>
// kernel: eq.10
= control target key start
LH: loop header
LB: loop body
LE: loop exit
PB: predicated region body
PF: predicated region fallthrough
CT: control target
= control target key end

     0   :  { %vm7_vm0 = vcmask 64512   ;;  %vm13_vm1 = vcmask 130112   ;;  %s39_s0 = inlined_call_operand.vmem [shape: s32[2,8], index: 0, kind: input, shape index: {}]   ;;  %s40_s1 = inlined_call_operand.vmem [shape: s32[16], index: 1, kind: output, shape index: {}]  }
   0x1   :  { %v4_v0 = vld [vmem:[%s39_s0] sm:$0x3]  ;;  %s22_s0 = smov 8  }
   0x2   :  { %5 = vst [vmem:[#allocation1] sm:$0x3] %v4_v0 }
   0x9   :  { %v10_v1 = vld [vmem:[#allocation1 + $0x1] sm:$0x1]   ;;  %v6_v2 = vld [vmem:[#allocation1] sm:$0x1]  }
   0xa   :  { %11 = vrot.lane.b32.xlu0 %v10_v1, %s22_s0  ;;  %8 = vst.msk [vmem:[#allocation0] sm:$0x1] %vm7_vm0, %v6_v2  }
  0x7c   :  { %v12_v3 = vpop.permute.xlu0 %11  }
  0x7d   :  { %14 = vst.msk [vmem:[#allocation0] sm:$0x1] %vm13_vm1, %v12_v3  }
  0x84   :  { %v17_v4 = vld [vmem:[#allocation0] sm:$0x1] }
  0x85   :  { %20 = vst [vmem:[%s40_s1] sm:$0x1] %v17_v4 }

// kernel: aggregator_forward.1
= control target key start
LH: loop header
LB: loop body
LE: loop exit
PB: predicated region body
PF: predicated region fallthrough
CT: control target
= control target key end

     0   :  { %s1387_s0 = inlined_call_operand.vmem [shape: f32[16,32], index: 0, kind: input, shape index: {}]   ;;  %s1388_s1 = inlined_call_operand.vmem [shape: f32[16,32], index: 1, kind: input, shape index: {}]   ;;  %s1389_s2 = inlined_call_operand.vmem [shape: f32[1,32], index: 2, kind: input, shape index: {}]   ;;  %s1390_s3 = inlined_call_operand.vmem [shape: f32[1,32], index: 3, kind: input, shape index: {}]   ;;  %s1391_s4 = inlined_call_operand.vmem [shape: f32[16,16], index: 4, kind: input, shape index: {}]   ;;  %s1392_s5 = inlined_call_operand.vmem [shape: f32[1,32,96], index: 5, kind: input, shape index: {}]   ;;  %s1393_s6 = inlined_call_operand.vmem [shape: f32[1,1,96], index: 6, kind: input, shape index: {}]   ;;  %s1394_s7 = inlined_call_operand.vmem [shape: f32[1,32,32], index: 7, kind: input, shape index: {}]   ;;  %s1395_s8 = inlined_call_operand.vmem [shape: f32[1,1,32], index: 8, kind: input, shape index: {}]   ;;  %s1396_s9 = inlined_call_operand.vmem [shape: f32[1,1,32], index: 9, kind: input, shape index: {}]   ;;  %s1397_s10 = inlined_call_operand.vmem [shape: f32[1,1,32], index: 10, kind: input, shape index: {}]   ;;  %s1398_s11 = inlined_call_operand.vmem [shape: f32[1,32,128], index: 11, kind: input, shape index: {}]   ;;  %s1399_s12 = inlined_call_operand.vmem [shape: f32[1,1,128], index: 12, kind: input, shape index: {}]   ;;  %s1400_s13 = inlined_call_operand.vmem [shape: f32[1,128,32], index: 13, kind: input, shape index: {}]   ;;  %s1401_s14 = inlined_call_operand.vmem [shape: f32[1,1,32], index: 14, kind: input, shape index: {}]   ;;  %s1402_s15 = inlined_call_operand.vmem [shape: f32[1,1,32], index: 15, kind: input, shape index: {}]   ;;  %s1403_s16 = inlined_call_operand.vmem [shape: f32[1,1,32], index: 16, kind: input, shape index: {}]   ;;  %s1404_s17 = inlined_call_operand.hbm [shape: f32[16,32], index: 17, kind: output, shape index: {}]  }
   0x1   :  { %1407 = sst [smem:[#allocation6_spill]] %s1387_s0 }
   0x2   :  { %1408 = sst [smem:[#allocation7_spill]] %s1388_s1 }
   0x3   :  { %1409 = sst [smem:[#allocation8_spill]] %s1399_s12 }
   0x4   :  { %s1410_s26 = sld [smem:[#allocation6_spill]]  ;;  %vm65_vm0 = vcmask 261120  }
   0x5   :  { %s1411_s12 = sld [smem:[#allocation7_spill]] }
   0xa   :  { %v57_v0 = vld [vmem:[%s1410_s26] sm:$0xff]  ;;  %v58_v2 = vld [vmem:[%s1410_s26 + $0x8] sm:$0xff] }
   0xb   :  { %v59_v1 = vld [vmem:[%s1411_s12] sm:$0xff]  ;;  %v60_v4 = vld [vmem:[%s1411_s12 + $0x8] sm:$0xff] }
   0xc   :  { %v61_v3 = vadd.f32 %v59_v1, %v57_v0  ;;  %v62_v6 = vadd.f32 %v60_v4, %v58_v2 }
   0xe   :  { %v66_v5 = vsel %vm65_vm0, %v61_v3, 0.0 }
   0xf   :  { %67 = vadd.xlane.f32.xlu0 %v66_v5 }
  0x10   :  { %22 = vsyncpa [#allocation4], 0  ;;  %v69_v7 = vsel %vm65_vm0, %v62_v6, 0.0  ;;  %v997_v8 = vmov 32.0   ;;  %v132_v25 = vld [vmem:[%s1392_s5 + $0x18] sm:$0xff]  ;;  %v131_v26 = vld [vmem:[%s1392_s5 + $0x10] sm:$0xff] }
  0x11   :  { %925 = vrcp.f32 %v997_v8  ;;  %155 = vmatpush.msra.mxu0 %v132_v25  ;;  %v130_v27 = vld [vmem:[%s1392_s5 + $0x8] sm:$0xff]  ;;  %v129_v28 = vld [vmem:[%s1392_s5] sm:$0xff]  ;;  %s998_s28 = smov 88   ;;  %s999_s29 = smov 96   ;;  %vm174_vm8 = vcmask 64512   ;;  %vm208_vm9 = vcmask 130048  }
  0x12   :  { %v915_v43 = vld [vmem:[%s1389_s2] ss:$0 sm:$0xff]  ;;  %s1000_s0 = smov 120   ;;  %s1001_s19 = smov 64   ;;  %vm372_vm10 = vcmask 130112   ;;  %vm479_vm11 = vcmask 195712  }
  0x13   :  { %156 = vmatpush.msra.mxu0 %v131_v26  ;;  %v916_v47 = vld [vmem:[%s1390_s3] ss:$0 sm:$0xff]  ;;  %s1002_s1 = smov 104   ;;  %s1004_s20 = smov 80   ;;  %vm586_vm12 = vcmask 261312  }
  0x14   :  { %v917_v58 = vld [vmem:[%s1393_s6] ss:$0 sm:$0xff]  ;;  %s1005_s21 = smov 112   ;;  %s1006_s22 = smov 56  }
  0x15   :  { %157 = vmatpush.msra.mxu0 %v130_v27  ;;  %s1007_s23 = smov 48   ;;  %s1008_s24 = smov 40  }
  0x16   :  { %s1009_s5 = smov 8   ;;  %s1010_s25 = smov 16  }
  0x17   :  { %70 = vadd.xlane.f32.xlu0 %v69_v7  ;;  %v926_v9 = vpop.eup %925  ;;  %158 = vmatpush.msra.mxu0 %v129_v28  ;;  %v1184_v7 = vld [vmem:[%s1391_s4 + $0x8] sm:$0xff]  ;;  %s1011_s26 = smov 24  }
  0x18   :  { %v73_v10 = vmul.f32 32.0, %v926_v9  ;;  %vm77_vm1 = vweird.f32 %v926_v9 }
  0x1a   :  { %v74_v11 = vsub.f32 1.0, %v73_v10 }
  0x1c   :  { %v75_v12 = vmul.f32 %v926_v9, %v74_v11 }
  0x1e   :  { %v76_v13 = vadd.f32 %v926_v9, %v75_v12 }
  0x20   :  { %v1118_v14 = vsel %vm77_vm1, %v926_v9, %v76_v13 }
  0x82   :  { %v68_v15 = vpop.xlane.xlu0 %67 }
  0x83   :  { %v79_v16 = vmul.f32 %v1118_v14, %v68_v15 }
  0x85   :  { %v81_v17 = vsub.f32 %v61_v3, %v79_v16  ;;  %v1177_v3 = vld [vmem:[%s1391_s4] sm:$0xff]  ;;  %s1003_s4 = smov 72  }
  0x87   :  { %v83_v18 = vmul.f32 %v81_v17, %v81_v17 }
  0x89   :  { %v85_v19 = vsel %vm65_vm0, %v83_v18, 0.0 }
  0x8a   :  { %86 = vadd.xlane.f32.xlu1 %v85_v19  ;;  %v71_v20 = vpop.xlane.xlu0 %70 }
  0x8b   :  { %v80_v21 = vmul.f32 %v1118_v14, %v71_v20 }
  0x8d   :  { %v82_v22 = vsub.f32 %v62_v6, %v80_v21 }
  0x8f   :  { %v84_v23 = vmul.f32 %v82_v22, %v82_v22 }
  0x91   :  { %v88_v24 = vsel %vm65_vm0, %v84_v23, 0.0 }
  0x92   :  { %89 = vadd.xlane.f32.xlu1 %v88_v24 }
  0xfd   :  { %v87_v29 = vpop.xlane.xlu1 %86 }
  0xfe   :  { %v91_v30 = vmul.f32 %v87_v29, %v1118_v14 }
 0x100   :  { %v93_v31 = vadd.f32 1e-12, %v91_v30 }
 0x102   :  { %927 = vrsqrt.f32 %v93_v31  ;;  %vm101_vm3 = vweird.f32 %v93_v31 }
 0x105   :  { %v90_v32 = vpop.xlane.xlu1 %89 }
 0x106   :  { %v92_v33 = vmul.f32 %v90_v32, %v1118_v14 }
 0x108   :  { %v928_v34 = vpop.eup %927  ;;  %v94_v35 = vadd.f32 1e-12, %v92_v33 }
 0x109   :  { %v96_v36 = vmul.f32 %v928_v34, %v93_v31  ;;  %vm102_vm2 = vweird.f32 %v928_v34 }
 0x10a   :  { %929 = vrsqrt.f32 %v94_v35  ;;  %vm103_vm4 = vmor %vm101_vm3, %vm102_vm2  ;;  %vm111_vm6 = vweird.f32 %v94_v35 }
 0x10b   :  { %v97_v37 = vmul.f32 %v928_v34, %v96_v36 }
 0x10d   :  { %v98_v38 = vmul.f32 0.5, %v97_v37 }
 0x10f   :  { %v99_v39 = vsub.f32 1.5, %v98_v38 }
 0x110   :  { %v930_v40 = vpop.eup %929 }
 0x111   :  { %v100_v41 = vmul.f32 %v928_v34, %v99_v39  ;;  %v106_v42 = vmul.f32 %v930_v40, %v94_v35  ;;  %vm112_vm5 = vweird.f32 %v930_v40 }
 0x112   :  { %vm113_vm7 = vmor %vm111_vm6, %vm112_vm5 }
 0x113   :  { %v104_v44 = vsel %vm103_vm4, %v928_v34, %v100_v41  ;;  %v107_v45 = vmul.f32 %v930_v40, %v106_v42 }
 0x114   :  { %v115_v46 = vmul.f32 %v104_v44, %v81_v17 }
 0x115   :  { %v108_v48 = vmul.f32 0.5, %v107_v45 }
 0x116   :  { %v120_v49 = vmul.f32 %v915_v43, %v115_v46 }
 0x117   :  { %v109_v50 = vsub.f32 1.5, %v108_v48 }
 0x118   :  { %v1144_v51 = vadd.f32 %v916_v47, %v120_v49 }
 0x119   :  { %v110_v52 = vmul.f32 %v930_v40, %v109_v50 }
 0x11a   :  { %846 = vmatmul.msk.f32.vlgmr.msra.gmra.mxu0 %vm65_vm0, %v1144_v51 }
 0x11b   :  { %v114_v53 = vsel %vm113_vm7, %v930_v40, %v110_v52 }
 0x11c   :  { %v116_v54 = vmul.f32 %v114_v53, %v82_v22 }
 0x11e   :  { %v121_v55 = vmul.f32 %v915_v43, %v116_v54 }
 0x120   :  { %v1148_v56 = vadd.f32 %v916_v47, %v121_v55 }
 0x122   :  { %847 = vmatmul.msk.f32.gmra.mxu0 %vm65_vm0, %v1148_v56 }
 0x197   :  { %v160_v57 = vpop.f32.mrf.mxu0 }
 0x198   :  { %v1160_v61 = vadd.f32 %v917_v58, %v160_v57 }
 0x19a   :  { %v166_v1 = vmul.f32 0.35355338, %v1160_v61 }
 0x19f   :  { %v163_v59 = vpop.f32.mrf.mxu0 }
 0x1a0   :  { %v1155_v60 = vadd.f32 %v917_v58, %v163_v59 }
 0x1a2   :  { %274 = vrot.lane.b32.xlu1 %v1155_v60, %s998_s28  ;;  %172 = vrot.lane.b32.xlu2 %v1155_v60, %s999_s29  ;;  %v1163_v62 = vmul.f32 0.35355338, %v1155_v60  ;;  %v1190_v11 = vpack.i.bf16 %v1160_v61, %v1155_v60 }
 0x1aa   :  { %170 = vrot.lane.b32.xlu2 %v1160_v61, %s999_s29  ;;  %270 = vrot.lane.b32.xlu1 %v1163_v62, %s1000_s0 }
 0x1fc   :  { %v173_v63 = vpop.permute.xlu2 %172 }
 0x1fd   :  { %848 = vmatpush.xpose.msk.msra.mxu1 %vm174_vm8, %v173_v63 }
 0x204   :  { %v171_v0 = vpop.permute.xlu2 %170 }
 0x205   :  { %849 = vmatpush.xpose.msk.msra.mxu1 %vm174_vm8, %v171_v0 }
 0x208   :  { %850 = vmatmul.msk.f32.vlgmr.msra.gmra.mxu1 %vm174_vm8, %v166_v1 }
 0x210   :  { %851 = vmatmul.msk.f32.gmra.mxu1 %vm174_vm8, %v1163_v62 }
 0x214   :  { %v275_v2 = vpop.permute.xlu1 %274 }
 0x215   :  { %876 = vmatpush.xpose.msk.msra.mxu3 %vm174_vm8, %v275_v2 }
 0x21c   :  { %v271_v12 = vpop.permute.xlu1 %270 }
 0x285   :  { %v202_v4 = vpop.f32.mrf.mxu1 }
 0x286   :  { %v203_v5 = vadd.f32 %v202_v4, %v1177_v3 }
 0x288   :  { %v209_v6 = vsel %vm208_vm9, %v203_v5, -inf }
 0x289   :  { %210 = vmax.xlane.f32.xlu0 %v209_v6 }
 0x28d   :  { %v205_v8 = vpop.f32.mrf.mxu1 }
 0x28e   :  { %v206_v9 = vadd.f32 %v205_v8, %v1184_v7 }
 0x290   :  { %v212_v10 = vsel %vm208_vm9, %v206_v9, -inf }
 0x291   :  { %213 = vmax.xlane.f32.xlu1 %v212_v10 }
 0x29d   :  { %896 = vrot.lane.b32.xlu0 %v1190_v11, %s1001_s19 }
 0x2a5   :  { %272 = vrot.lane.b32.xlu0 %v1160_v61, %s998_s28 }
 0x2aa   :  { %482 = vrot.lane.b32.xlu1 %v166_v1, %s1002_s1 }
 0x2ad   :  { %268 = vrot.lane.b32.xlu0 %v166_v1, %s1000_s0 }
 0x2b5   :  { %486 = vrot.lane.b32.xlu0 %v1160_v61, %s1003_s4 }
 0x2bd   :  { %381 = vrot.lane.b32.xlu0 %v1155_v60, %s1004_s20 }
 0x2c5   :  { %484 = vrot.lane.b32.xlu0 %v1163_v62, %s1002_s1 }
 0x2fc   :  { %v211_v13 = vpop.xlane.xlu0 %210 }
 0x2fd   :  { %v215_v15 = vsub.f32 %v203_v5, %v211_v13 }
 0x2ff   :  { %v217_v16 = vmul.f32 1.442695, %v215_v15 }
 0x301   :  { %931 = vpow2.f32 %v217_v16 }
 0x304   :  { %v214_v17 = vpop.xlane.xlu1 %213 }
 0x305   :  { %v216_v18 = vsub.f32 %v206_v9, %v214_v17 }
 0x307   :  { %v932_v19 = vpop.eup %931  ;;  %v219_v20 = vmul.f32 1.442695, %v216_v18 }
 0x308   :  { %v221_v21 = vsel %vm208_vm9, %v932_v19, 0.0 }
 0x309   :  { %933 = vpow2.f32 %v219_v20  ;;  %222 = vadd.xlane.f32.xlu2 %v221_v21 }
 0x30f   :  { %v934_v22 = vpop.eup %933  ;;  %v897_v23 = vpop.permute.xlu0 %896 }
 0x310   :  { %v224_v24 = vsel %vm208_vm9, %v934_v22, 0.0  ;;  %v898_v25 = vunpack.i.l.bf16 %v897_v23  ;;  %v899_v26 = vunpack.i.h.bf16 %v897_v23 }
 0x311   :  { %225 = vadd.xlane.f32.xlu1 %v224_v24 }
 0x312   :  { %257 = vmatpush.msra.mxu2 %v898_v25 }
 0x314   :  { %258 = vmatpush.msra.mxu2 %v899_v26 }
 0x316   :  { %854 = vmatpush.xpose.msk.msrb.mxu2 %vm174_vm8, %v275_v2 }
 0x317   :  { %v273_v27 = vpop.permute.xlu0 %272 }
 0x318   :  { %877 = vmatpush.xpose.msk.msra.mxu3 %vm174_vm8, %v273_v27 }
 0x31a   :  { %855 = vmatpush.xpose.msk.msrb.mxu2 %vm174_vm8, %v273_v27 }
 0x31b   :  { %857 = vmatmul.msk.f32.vlgmr.msra.gmra.mxu3 %vm174_vm8, %v271_v12 }
 0x31c   :  { %v483_v31 = vpop.permute.xlu1 %482 }
 0x31f   :  { %v269_v28 = vpop.permute.xlu0 %268 }
 0x321   :  { %488 = vrot.lane.b32.xlu2 %v1155_v60, %s1003_s4 }
 0x327   :  { %v487_v29 = vpop.permute.xlu0 %486 }
 0x329   :  { %377 = vrot.lane.b32.xlu2 %v1163_v62, %s1005_s21 }
 0x32a   :  { %379 = vrot.lane.b32.xlu1 %v1160_v61, %s1004_s20 }
 0x32f   :  { %v382_v30 = vpop.permute.xlu0 %381 }
 0x330   :  { %860 = vmatpush.xpose.msk.msrb.mxu0 %vm174_vm8, %v382_v30 }
 0x332   :  { %375 = vrot.lane.b32.xlu1 %v166_v1, %s1005_s21  ;;  %s834_s21 = sshll.u32 %s1404_s17, 4  ;;  %s835_s21 = int_to_ptr.hbm [resolvable:$true] %s834_s21 }
 0x337   :  { %v485_v39 = vpop.permute.xlu0 %484 }
 0x37c   :  { %v223_v32 = vpop.xlane.xlu2 %222 }
 0x37d   :  { %935 = vrcp.f32 %v223_v32 }
 0x383   :  { %v936_v33 = vpop.eup %935 }
 0x384   :  { %v489_v34 = vpop.permute.xlu2 %488  ;;  %v226_v35 = vpop.xlane.xlu1 %225  ;;  %v229_v36 = vmul.f32 %v936_v33, %v932_v19 }
 0x385   :  { %937 = vrcp.f32 %v226_v35  ;;  %866 = vmatpush.xpose.msk.msrb.mxu3 %vm174_vm8, %v489_v34 }
 0x386   :  { %852 = vmatmul.msk.f32.vlgmr.msra.gmra.mxu2 %vm208_vm9, %v229_v36 }
 0x389   :  { %867 = vmatpush.xpose.msk.msrb.mxu3 %vm174_vm8, %v487_v29 }
 0x38b   :  { %v938_v37 = vpop.eup %937 }
 0x38c   :  { %868 = vmatmul.msk.f32.vlgmr.msrb.gmra.mxu3 %vm174_vm8, %v483_v31  ;;  %v230_v38 = vmul.f32 %v938_v37, %v934_v22  ;;  %v378_v45 = vpop.permute.xlu2 %377 }
 0x38e   :  { %853 = vmatmul.msk.f32.gmra.mxu2 %vm208_vm9, %v230_v38 }
 0x394   :  { %869 = vmatmul.msk.f32.gmra.mxu3 %vm174_vm8, %v485_v39 }
 0x396   :  { %856 = vmatmul.msk.f32.vlgmr.msrb.gmra.mxu2 %vm174_vm8, %v269_v28 }
 0x39c   :  { %v380_v40 = vpop.permute.xlu1 %379 }
 0x39d   :  { %861 = vmatpush.xpose.msk.msrb.mxu0 %vm174_vm8, %v380_v40 }
 0x39e   :  { %v304_v41 = vpop.f32.mrf.mxu3 }
 0x39f   :  { %v305_v42 = vadd.f32 %v304_v41, %v1184_v7 }
 0x3a1   :  { %v310_v43 = vsel %vm208_vm9, %v305_v42, -inf }
 0x3a2   :  { %311 = vmax.xlane.f32.xlu1 %v310_v43 }
 0x3a4   :  { %v376_v44 = vpop.permute.xlu1 %375 }
 0x3a5   :  { %862 = vmatmul.msk.f32.vlgmr.msrb.gmra.mxu0 %vm174_vm8, %v376_v44 }
 0x3ad   :  { %863 = vmatmul.msk.f32.gmra.mxu0 %vm174_vm8, %v378_v45 }
 0x409   :  { %v260_v46 = vpop.f32.mrf.mxu2 }
 0x40a   :  { %266 = vst.msk [vmem:[#allocation2] sm:$0xff] %vm174_vm8, %v260_v46 }
 0x40f   :  { %v515_v47 = vpop.f32.mrf.mxu3 }
 0x410   :  { %v516_v48 = vadd.f32 %v515_v47, %v1177_v3 }
 0x411   :  { %v263_v49 = vpop.f32.mrf.mxu2 }
 0x412   :  { %267 = vst.msk [vmem:[#allocation2 + $0x8] sm:$0xff] %vm174_vm8, %v263_v49  ;;  %v521_v50 = vsel %vm208_vm9, %v516_v48, -inf }
 0x413   :  { %522 = vmax.xlane.f32.xlu2 %v521_v50 }
 0x415   :  { %v312_v59 = vpop.xlane.xlu1 %311 }
 0x416   :  { %v314_v62 = vsub.f32 %v305_v42, %v312_v59 }
 0x417   :  { %v518_v52 = vpop.f32.mrf.mxu3 }
 0x418   :  { %v519_v53 = vadd.f32 %v518_v52, %v1184_v7  ;;  %v317_v0 = vmul.f32 1.442695, %v314_v62 }
 0x419   :  { %v301_v54 = vpop.f32.mrf.mxu2 }
 0x41a   :  { %v302_v55 = vadd.f32 %v301_v54, %v1177_v3  ;;  %v524_v57 = vsel %vm208_vm9, %v519_v53, -inf  ;;  %939 = vpow2.f32 %v317_v0 }
 0x41b   :  { %525 = vmax.xlane.f32.xlu2 %v524_v57 }
 0x41c   :  { %v307_v58 = vsel %vm208_vm9, %v302_v55, -inf }
 0x41d   :  { %308 = vmax.xlane.f32.xlu0 %v307_v58 }
 0x420   :  { %v1236_v5 = vpop.eup %939 }
 0x422   :  { %v408_v60 = vpop.f32.mrf.mxu0 }
 0x423   :  { %v409_v61 = vadd.f32 %v408_v60, %v1177_v3  ;;  %v322_v3 = vsel %vm208_vm9, %v1236_v5, 0.0 }
 0x425   :  { %v414_v63 = vsel %vm208_vm9, %v409_v61, -inf }
 0x426   :  { %415 = vmax.xlane.f32.xlu0 %v414_v63 }
 0x42a   :  { %v411_v1 = vpop.f32.mrf.mxu0 }
 0x42b   :  { %v412_v2 = vadd.f32 %v411_v1, %v1184_v7 }
 0x42d   :  { %v417_v4 = vsel %vm208_vm9, %v412_v2, -inf }
 0x42e   :  { %418 = vmax.xlane.f32.xlu1 %v417_v4  ;;  %v594_v4 = vld [vmem:[%s1394_s7 + $0x18] sm:$0xff] }
 0x42f   :  { %617 = vmatpush.msra.mxu0 %v594_v4  ;;  %v920_v4 = vld [vmem:[%s1397_s10] ss:$0 sm:$0xff] }
 0x433   :  { %901 = vrot.lane.b32.xlu2 %v1190_v11, %s1006_s22 }
 0x436   :  { %323 = vadd.xlane.f32.xlu1 %v322_v3  ;;  %v592_v3 = vld [vmem:[%s1394_s7 + $0x8] sm:$0xff] }
 0x43b   :  { %911 = vrot.lane.b32.xlu2 %v1190_v11, %s1007_s23 }
 0x486   :  { %v523_v6 = vpop.xlane.xlu2 %522 }
 0x487   :  { %v527_v8 = vsub.f32 %v516_v48, %v523_v6  ;;  %v591_v6 = vld [vmem:[%s1394_s7] sm:$0xff] }
 0x489   :  { %v529_v9 = vmul.f32 1.442695, %v527_v8 }
 0x48b   :  { %941 = vpow2.f32 %v529_v9 }
 0x48e   :  { %v526_v7 = vpop.xlane.xlu2 %525 }
 0x48f   :  { %v528_v23 = vsub.f32 %v519_v53, %v526_v7 }
 0x490   :  { %v309_v10 = vpop.xlane.xlu0 %308 }
 0x491   :  { %v1242_v12 = vpop.eup %941  ;;  %v313_v13 = vsub.f32 %v302_v55, %v309_v10  ;;  %v531_v28 = vmul.f32 1.442695, %v528_v23 }
 0x492   :  { %v533_v15 = vsel %vm208_vm9, %v1242_v12, 0.0 }
 0x493   :  { %v315_v16 = vmul.f32 1.442695, %v313_v13  ;;  %534 = vadd.xlane.f32.xlu0 %v533_v15 }
 0x495   :  { %943 = vpow2.f32 %v315_v16 }
 0x496   :  { %v902_v17 = vpop.permute.xlu2 %901 }
 0x497   :  { %v903_v18 = vunpack.i.l.bf16 %v902_v17  ;;  %v904_v19 = vunpack.i.h.bf16 %v902_v17  ;;  %v918_v17 = vld [vmem:[%s1395_s8] ss:$0 sm:$0xff] }
 0x499   :  { %355 = vmatpush.msra.mxu2 %v903_v18  ;;  %v416_v20 = vpop.xlane.xlu0 %415 }
 0x49a   :  { %v420_v21 = vsub.f32 %v409_v61, %v416_v20 }
 0x49b   :  { %v944_v22 = vpop.eup %943  ;;  %356 = vmatpush.msra.mxu2 %v904_v19 }
 0x49c   :  { %v422_v24 = vmul.f32 1.442695, %v420_v21  ;;  %v319_v25 = vsel %vm208_vm9, %v944_v22, 0.0 }
 0x49d   :  { %320 = vadd.xlane.f32.xlu0 %v319_v25 }
 0x49e   :  { %945 = vpow2.f32 %v422_v24  ;;  %v912_v26 = vpop.permute.xlu2 %911 }
 0x49f   :  { %v913_v27 = vunpack.i.l.bf16 %v912_v26  ;;  %v914_v30 = vunpack.i.h.bf16 %v912_v26  ;;  %947 = vpow2.f32 %v531_v28 }
 0x4a1   :  { %462 = vmatpush.msrb.mxu1 %v913_v27  ;;  %v419_v29 = vpop.xlane.xlu1 %418 }
 0x4a2   :  { %v421_v32 = vsub.f32 %v412_v2, %v419_v29 }
 0x4a3   :  { %463 = vmatpush.msrb.mxu1 %v914_v30 }
 0x4a4   :  { %v946_v31 = vpop.eup %945  ;;  %v424_v34 = vmul.f32 1.442695, %v421_v32 }
 0x4a5   :  { %v426_v33 = vsel %vm208_vm9, %v946_v31, 0.0  ;;  %v948_v35 = vpop.eup %947 }
 0x4a6   :  { %427 = vadd.xlane.f32.xlu1 %v426_v33  ;;  %949 = vpow2.f32 %v424_v34  ;;  %v536_v36 = vsel %vm208_vm9, %v948_v35, 0.0  ;;  %v689_v34 = vld [vmem:[%s1398_s11 + $0x18] sm:$0xff] }
 0x4a7   :  { %712 = vmatpush.msra.mxu1 %v689_v34 }
 0x4a9   :  { %v324_v41 = vpop.xlane.xlu1 %323 }
 0x4ac   :  { %v950_v37 = vpop.eup %949 }
 0x4ad   :  { %v429_v38 = vsel %vm208_vm9, %v950_v37, 0.0 }
 0x4ae   :  { %537 = vadd.xlane.f32.xlu1 %v536_v36  ;;  %v687_v36 = vld [vmem:[%s1398_s11 + $0x8] sm:$0xff] }
 0x4b1   :  { %906 = vrot.lane.b32.xlu0 %v1190_v11, %s1008_s24 }
 0x4b6   :  { %430 = vadd.xlane.f32.xlu1 %v429_v38 }
 0x506   :  { %v535_v39 = vpop.xlane.xlu0 %534 }
 0x510   :  { %v321_v40 = vpop.xlane.xlu0 %320 }
 0x511   :  { %951 = vrcp.f32 %v321_v40 }
 0x512   :  { %953 = vrcp.f32 %v324_v41  ;;  %v740_v41 = vld [vmem:[%s1400_s13 + $0x78] sm:$0xff] }
 0x513   :  { %745 = vmatpush.msra.mxu3 %v740_v41 }
 0x517   :  { %v952_v42 = vpop.eup %951 }
 0x518   :  { %v327_v43 = vmul.f32 %v952_v42, %v944_v22  ;;  %v954_v45 = vpop.eup %953  ;;  %v739_v42 = vld [vmem:[%s1400_s13 + $0x70] sm:$0xff] }
 0x519   :  { %v428_v44 = vpop.xlane.xlu1 %427  ;;  %v328_v11 = vmul.f32 %v954_v45, %v1236_v5  ;;  %v593_v5 = vld [vmem:[%s1394_s7 + $0x10] sm:$0xff]  ;;  %746 = vmatpush.msra.mxu3 %v739_v42  ;;  %s1412_s7 = sld [smem:[#allocation8_spill]] }
 0x51a   :  { %955 = vrcp.f32 %v428_v44  ;;  %858 = vmatmul.msk.f32.vlgmr.msra.gmra.mxu2 %vm208_vm9, %v327_v43  ;;  %618 = vmatpush.msra.mxu0 %v593_v5  ;;  %v738_v43 = vld [vmem:[%s1400_s13 + $0x68] sm:$0xff] }
 0x51b   :  { %957 = vrcp.f32 %v535_v39  ;;  %747 = vmatpush.msra.mxu3 %v738_v43  ;;  %v730_v5 = vld [vmem:[%s1400_s13 + $0x28] sm:$0xff] }
 0x51c   :  { %619 = vmatpush.msra.mxu0 %v592_v3 }
 0x51e   :  { %620 = vmatpush.msra.mxu0 %v591_v6 }
 0x520   :  { %v956_v46 = vpop.eup %955 }
 0x521   :  { %v538_v47 = vpop.xlane.xlu1 %537  ;;  %v434_v48 = vmul.f32 %v956_v46, %v946_v31  ;;  %v958_v52 = vpop.eup %957  ;;  %v737_v46 = vld [vmem:[%s1400_s13 + $0x60] sm:$0xff] }
 0x522   :  { %859 = vmatmul.msk.f32.gmra.mxu2 %vm208_vm9, %v328_v11  ;;  %959 = vrcp.f32 %v538_v47  ;;  %v541_v54 = vmul.f32 %v958_v52, %v1242_v12  ;;  %748 = vmatpush.msra.mxu3 %v737_v46 }
 0x523   :  { %v907_v49 = vpop.permute.xlu0 %906  ;;  %864 = vmatmul.msk.f32.vlgmr.msrb.gmra.mxu1 %vm208_vm9, %v434_v48  ;;  %v736_v48 = vld [vmem:[%s1400_s13 + $0x58] sm:$0xff] }
 0x524   :  { %v908_v50 = vunpack.i.l.bf16 %v907_v49  ;;  %v909_v53 = vunpack.i.h.bf16 %v907_v49  ;;  %749 = vmatpush.msra.mxu3 %v736_v48 }
 0x526   :  { %569 = vmatpush.msrb.mxu2 %v908_v50  ;;  %v735_v50 = vld [vmem:[%s1400_s13 + $0x50] sm:$0xff] }
 0x527   :  { %750 = vmatpush.msra.mxu3 %v735_v50 }
 0x528   :  { %570 = vmatpush.msrb.mxu2 %v909_v53  ;;  %v960_v57 = vpop.eup %959  ;;  %v734_v53 = vld [vmem:[%s1400_s13 + $0x48] sm:$0xff] }
 0x529   :  { %v431_v55 = vpop.xlane.xlu1 %430  ;;  %v542_v59 = vmul.f32 %v960_v57, %v948_v35  ;;  %v688_v35 = vld [vmem:[%s1398_s11 + $0x10] sm:$0xff]  ;;  %751 = vmatpush.msra.mxu3 %v734_v53 }
 0x52a   :  { %961 = vrcp.f32 %v431_v55  ;;  %870 = vmatmul.msk.f32.vlgmr.msrb.gmra.mxu2 %vm208_vm9, %v541_v54  ;;  %713 = vmatpush.msra.mxu1 %v688_v35  ;;  %v733_v55 = vld [vmem:[%s1400_s13 + $0x40] sm:$0xff] }
 0x52b   :  { %752 = vmatpush.msra.mxu3 %v733_v55 }
 0x52c   :  { %714 = vmatpush.msra.mxu1 %v687_v36 }
 0x530   :  { %v962_v58 = vpop.eup %961 }
 0x531   :  { %v435_v60 = vmul.f32 %v962_v58, %v950_v37  ;;  %v686_v37 = vld [vmem:[%s1398_s11] sm:$0xff] }
 0x532   :  { %871 = vmatmul.msk.f32.gmra.mxu2 %vm208_vm9, %v542_v59  ;;  %715 = vmatpush.msra.mxu1 %v686_v37  ;;  %v732_v59 = vld [vmem:[%s1400_s13 + $0x38] sm:$0xff] }
 0x533   :  { %865 = vmatmul.msk.f32.gmra.mxu1 %vm208_vm9, %v435_v60  ;;  %753 = vmatpush.msra.mxu3 %v732_v59 }
 0x59d   :  { %v358_v61 = vpop.f32.mrf.mxu2 }
 0x59e   :  { %366 = vrot.lane.b32.xlu0 %v358_v61, %s1009_s5 }
 0x5a0   :  { %v465_v62 = vpop.f32.mrf.mxu1 }
 0x5a1   :  { %473 = vrot.lane.b32.xlu2 %v465_v62, %s1010_s25  ;;  %v919_v62 = vld [vmem:[%s1396_s9] ss:$0 sm:$0xff] }
 0x5a5   :  { %v361_v63 = vpop.f32.mrf.mxu2 }
 0x5a6   :  { %368 = vrot.lane.b32.xlu0 %v361_v63, %s1009_s5  ;;  %v731_v63 = vld [vmem:[%s1400_s13 + $0x30] sm:$0xff] }
 0x5a7   :  { %754 = vmatpush.msra.mxu3 %v731_v63  ;;  %v924_v63 = vld [vmem:[%s1403_s16] ss:$0 sm:$0xff]  ;;  %s1013_s16 = smov 128  }
 0x5a9   :  { %755 = vmatpush.msra.mxu3 %v730_v5 }
 0x5ad   :  { %v572_v0 = vpop.f32.mrf.mxu2 }
 0x5ae   :  { %580 = vrot.lane.b32.xlu1 %v572_v0, %s1011_s26 }
 0x5b0   :  { %v468_v1 = vpop.f32.mrf.mxu1 }
 0x5b1   :  { %475 = vrot.lane.b32.xlu2 %v468_v1, %s1010_s25 }
 0x5b5   :  { %v575_v2 = vpop.f32.mrf.mxu2 }
 0x5b6   :  { %582 = vrot.lane.b32.xlu0 %v575_v2, %s1011_s26 }
 0x5fb   :  { %v474_v9 = vpop.permute.xlu2 %473 }
 0x60b   :  { %v476_v10 = vpop.permute.xlu2 %475 }
 0x610   :  { %v367_v8 = vpop.permute.xlu0 %366 }
 0x611   :  { %373 = vst.msk [vmem:[#allocation2] sm:$0xff] %vm372_vm10, %v367_v8  ;;  %v729_v8 = vld [vmem:[%s1400_s13 + $0x20] sm:$0xff] }
 0x612   :  { %480 = vst.msk [vmem:[#allocation2] sm:$0xff] %vm479_vm11, %v474_v9  ;;  %756 = vmatpush.msra.mxu3 %v729_v8 }
 0x618   :  { %v369_v7 = vpop.permute.xlu0 %368 }
 0x619   :  { %374 = vst.msk [vmem:[#allocation2 + $0x8] sm:$0xff] %vm372_vm10, %v369_v7 }
 0x61a   :  { %481 = vst.msk [vmem:[#allocation2 + $0x8] sm:$0xff] %vm479_vm11, %v476_v10  ;;  %v728_v10 = vld [vmem:[%s1400_s13 + $0x18] sm:$0xff] }
 0x61b   :  { %757 = vmatpush.msra.mxu3 %v728_v10 }
 0x620   :  { %v581_v12 = vpop.permute.xlu1 %580 }
 0x621   :  { %587 = vst.msk [vmem:[#allocation2] sm:$0xff] %vm586_vm12, %v581_v12 }
 0x628   :  { %v583_v13 = vpop.permute.xlu0 %582  ;;  %v589_v15 = vld [vmem:[#allocation2] sm:$0xff] }
 0x629   :  { %588 = vst.msk [vmem:[#allocation2 + $0x8] sm:$0xff] %vm586_vm12, %v583_v13  ;;  %872 = vmatmul.msk.f32.vlgmr.msra.gmra.mxu0 %vm65_vm0, %v589_v15 }
 0x630   :  { %v590_v16 = vld [vmem:[#allocation2 + $0x8] sm:$0xff] }
 0x631   :  { %873 = vmatmul.msk.f32.gmra.mxu0 %vm65_vm0, %v590_v16 }
 0x6a6   :  { %v622_v18 = vpop.f32.mrf.mxu0 }
 0x6a7   :  { %v623_v19 = vadd.f32 %v918_v17, %v622_v18  ;;  %v727_v18 = vld [vmem:[%s1400_s13 + $0x10] sm:$0xff] }
 0x6a8   :  { %758 = vmatpush.msra.mxu3 %v727_v18 }
 0x6a9   :  { %v628_v20 = vadd.f32 %v623_v19, %v1144_v51  ;;  %v726_v19 = vld [vmem:[%s1400_s13 + $0x8] sm:$0xff] }
 0x6aa   :  { %759 = vmatpush.msra.mxu3 %v726_v19 }
 0x6ab   :  { %v632_v21 = vsel %vm65_vm0, %v628_v20, 0.0 }
 0x6ac   :  { %633 = vadd.xlane.f32.xlu2 %v632_v21  ;;  %v921_v21 = vld [vmem:[%s1412_s7] ss:$0 sm:$0xff] }
 0x6ae   :  { %v625_v22 = vpop.f32.mrf.mxu0 }
 0x6af   :  { %v626_v23 = vadd.f32 %v918_v17, %v625_v22 }
 0x6b1   :  { %v629_v24 = vadd.f32 %v626_v23, %v1148_v56 }
 0x6b3   :  { %v635_v25 = vsel %vm65_vm0, %v629_v24, 0.0 }
 0x6b4   :  { %636 = vadd.xlane.f32.xlu0 %v635_v25 }
 0x71f   :  { %v634_v26 = vpop.xlane.xlu2 %633 }
 0x720   :  { %v638_v27 = vmul.f32 %v634_v26, %v1118_v14 }
 0x722   :  { %v640_v28 = vsub.f32 %v628_v20, %v638_v27  ;;  %v725_v20 = vld [vmem:[%s1400_s13] sm:$0xff] }
 0x723   :  { %760 = vmatpush.msra.mxu3 %v725_v20 }
 0x724   :  { %v642_v29 = vmul.f32 %v640_v28, %v640_v28 }
 0x726   :  { %v644_v30 = vsel %vm65_vm0, %v642_v29, 0.0 }
 0x727   :  { %v637_v31 = vpop.xlane.xlu0 %636  ;;  %645 = vadd.xlane.f32.xlu1 %v644_v30 }
 0x728   :  { %v639_v51 = vmul.f32 %v637_v31, %v1118_v14 }
 0x72a   :  { %v1285_v32 = vsub.f32 %v629_v24, %v639_v51 }
 0x72c   :  { %v643_v33 = vmul.f32 %v1285_v32, %v1285_v32 }
 0x72e   :  { %v647_v56 = vsel %vm65_vm0, %v643_v33, 0.0 }
 0x72f   :  { %648 = vadd.xlane.f32.xlu2 %v647_v56 }
 0x79a   :  { %v646_v38 = vpop.xlane.xlu1 %645 }
 0x79b   :  { %v650_v39 = vmul.f32 %v646_v38, %v1118_v14 }
 0x79d   :  { %v652_v40 = vadd.f32 1e-05, %v650_v39 }
 0x79f   :  { %963 = vrsqrt.f32 %v652_v40  ;;  %vm660_vm14 = vweird.f32 %v652_v40 }
 0x7a2   :  { %v649_v44 = vpop.xlane.xlu2 %648 }
 0x7a3   :  { %v651_v45 = vmul.f32 %v649_v44, %v1118_v14 }
 0x7a5   :  { %v964_v11 = vpop.eup %963  ;;  %v653_v47 = vadd.f32 1e-05, %v651_v45 }
 0x7a6   :  { %v655_v49 = vmul.f32 %v964_v11, %v652_v40  ;;  %vm661_vm13 = vweird.f32 %v964_v11 }
 0x7a7   :  { %965 = vrsqrt.f32 %v653_v47  ;;  %vm662_vm15 = vmor %vm660_vm14, %vm661_vm13  ;;  %vm670_vm2 = vweird.f32 %v653_v47 }
 0x7a8   :  { %v656_v52 = vmul.f32 %v964_v11, %v655_v49 }
 0x7aa   :  { %v657_v54 = vmul.f32 0.5, %v656_v52 }
 0x7ac   :  { %v658_v57 = vsub.f32 1.5, %v657_v54 }
 0x7ad   :  { %v966_v58 = vpop.eup %965 }
 0x7ae   :  { %v659_v60 = vmul.f32 %v964_v11, %v658_v57  ;;  %v665_v61 = vmul.f32 %v966_v58, %v653_v47  ;;  %vm671_vm1 = vweird.f32 %v966_v58 }
 0x7af   :  { %vm672_vm3 = vmor %vm670_vm2, %vm671_vm1 }
 0x7b0   :  { %v663_v0 = vsel %vm662_vm15, %v964_v11, %v659_v60  ;;  %v666_v1 = vmul.f32 %v966_v58, %v665_v61  ;;  %v923_v60 = vld [vmem:[%s1402_s15] ss:$0 sm:$0xff]  ;;  %s1012_s15 = smov [#allocation3]  }
 0x7b1   :  { %v674_v2 = vmul.f32 %v663_v0, %v640_v28  ;;  %v922_v28 = vld [vmem:[%s1401_s14] ss:$0 sm:$0xff]  ;;  %s832_s1 = sshll.u32 %s1012_s15, 4  ;;  %s833_s1 = int_to_ptr.vmem [resolvable:$true] %s832_s1 }
 0x7b2   :  { %v667_v3 = vmul.f32 0.5, %v666_v1 }
 0x7b3   :  { %v679_v6 = vmul.f32 %v919_v62, %v674_v2 }
 0x7b4   :  { %v668_v9 = vsub.f32 1.5, %v667_v3 }
 0x7b5   :  { %v684_v7 = vadd.f32 %v920_v4, %v679_v6 }
 0x7b6   :  { %v669_v12 = vmul.f32 %v966_v58, %v668_v9 }
 0x7b7   :  { %874 = vmatmul.msk.f32.vlgmr.msra.gmra.mxu1 %vm65_vm0, %v684_v7 }
 0x7b8   :  { %v673_v13 = vsel %vm672_vm3, %v966_v58, %v669_v12 }
 0x7b9   :  { %v675_v15 = vmul.f32 %v673_v13, %v1285_v32 }
 0x7bb   :  { %v680_v16 = vmul.f32 %v919_v62, %v675_v15 }
 0x7bd   :  { %v685_v17 = vadd.f32 %v920_v4, %v680_v16 }
 0x7bf   :  { %875 = vmatmul.msk.f32.gmra.mxu1 %vm65_vm0, %v685_v17 }
 0x834   :  { %v717_v22 = vpop.f32.mrf.mxu1 }
 0x835   :  { %v718_v23 = vadd.f32 %v921_v21, %v717_v22 }
 0x837   :  { %v723_v24 = vmax.f32 %v718_v23, 0.0 }
 0x839   :  { %761 = vmatmul.f32.vlgmr.msra.gmra.mxu3 %v723_v24 }
 0x83c   :  { %v720_v25 = vpop.f32.mrf.mxu1 }
 0x83d   :  { %v721_v26 = vadd.f32 %v921_v21, %v720_v25 }
 0x83f   :  { %v724_v27 = vmax.f32 %v721_v26, 0.0 }
 0x841   :  { %764 = vmatmul.f32.gmra.mxu3 %v724_v27 }
 0x8bc   :  { %v762_v29 = vpop.f32.mrf.mxu3 }
 0x8bd   :  { %v763_v30 = vadd.f32 %v922_v28, %v762_v29 }
 0x8bf   :  { %v768_v31 = vadd.f32 %v763_v30, %v684_v7 }
 0x8c1   :  { %v772_v51 = vsel %vm65_vm0, %v768_v31, 0.0 }
 0x8c2   :  { %773 = vadd.xlane.f32.xlu2 %v772_v51 }
 0x8c4   :  { %v765_v32 = vpop.f32.mrf.mxu3 }
 0x8c5   :  { %v766_v33 = vadd.f32 %v922_v28, %v765_v32 }
 0x8c7   :  { %v769_v56 = vadd.f32 %v766_v33, %v685_v17 }
 0x8c9   :  { %v775_v34 = vsel %vm65_vm0, %v769_v56, 0.0 }
 0x8ca   :  { %776 = vadd.xlane.f32.xlu0 %v775_v34 }
 0x935   :  { %v774_v35 = vpop.xlane.xlu2 %773 }
 0x936   :  { %v778_v36 = vmul.f32 %v774_v35, %v1118_v14 }
 0x938   :  { %v780_v37 = vsub.f32 %v768_v31, %v778_v36 }
 0x93a   :  { %v782_v38 = vmul.f32 %v780_v37, %v780_v37 }
 0x93c   :  { %v784_v39 = vsel %vm65_vm0, %v782_v38, 0.0 }
 0x93d   :  { %v777_v40 = vpop.xlane.xlu0 %776  ;;  %785 = vadd.xlane.f32.xlu1 %v784_v39 }
 0x93e   :  { %v779_v41 = vmul.f32 %v777_v40, %v1118_v14 }
 0x940   :  { %v781_v42 = vsub.f32 %v769_v56, %v779_v41 }
 0x942   :  { %v783_v43 = vmul.f32 %v781_v42, %v781_v42 }
 0x944   :  { %v787_v44 = vsel %vm65_vm0, %v783_v43, 0.0 }
 0x945   :  { %788 = vadd.xlane.f32.xlu2 %v787_v44 }
 0x9b0   :  { %v786_v45 = vpop.xlane.xlu1 %785 }
 0x9b1   :  { %v790_v46 = vmul.f32 %v786_v45, %v1118_v14 }
 0x9b3   :  { %v792_v11 = vadd.f32 1e-05, %v790_v46 }
 0x9b5   :  { %967 = vrsqrt.f32 %v792_v11  ;;  %vm800_vm5 = vweird.f32 %v792_v11 }
 0x9b8   :  { %v789_v47 = vpop.xlane.xlu2 %788 }
 0x9b9   :  { %v791_v48 = vmul.f32 %v789_v47, %v1118_v14 }
 0x9bb   :  { %v968_v49 = vpop.eup %967  ;;  %v793_v50 = vadd.f32 1e-05, %v791_v48 }
 0x9bc   :  { %v795_v52 = vmul.f32 %v968_v49, %v792_v11  ;;  %vm801_vm4 = vweird.f32 %v968_v49 }
 0x9bd   :  { %969 = vrsqrt.f32 %v793_v50  ;;  %vm802_vm6 = vmor %vm800_vm5, %vm801_vm4  ;;  %vm810_vm8 = vweird.f32 %v793_v50 }
 0x9be   :  { %v796_v53 = vmul.f32 %v968_v49, %v795_v52 }
 0x9c0   :  { %v797_v54 = vmul.f32 0.5, %v796_v53 }
 0x9c2   :  { %v798_v55 = vsub.f32 1.5, %v797_v54 }
 0x9c3   :  { %v970_v57 = vpop.eup %969 }
 0x9c4   :  { %v799_v58 = vmul.f32 %v968_v49, %v798_v55  ;;  %v805_v59 = vmul.f32 %v970_v57, %v793_v50  ;;  %vm811_vm7 = vweird.f32 %v970_v57 }
 0x9c5   :  { %vm812_vm9 = vmor %vm810_vm8, %vm811_vm7 }
 0x9c6   :  { %v803_v61 = vsel %vm802_vm6, %v968_v49, %v799_v58  ;;  %v806_v62 = vmul.f32 %v970_v57, %v805_v59 }
 0x9c7   :  { %v814_v14 = vmul.f32 %v803_v61, %v780_v37 }
 0x9c8   :  { %v807_v0 = vmul.f32 0.5, %v806_v62 }
 0x9c9   :  { %v819_v1 = vmul.f32 %v923_v60, %v814_v14 }
 0x9ca   :  { %v808_v2 = vsub.f32 1.5, %v807_v0 }
 0x9cb   :  { %v824_v4 = vadd.f32 %v924_v63, %v819_v1 }
 0x9cc   :  { %v809_v5 = vmul.f32 %v970_v57, %v808_v2 }
 0x9cd   :  { %826 = vst.msk [vmem:[#allocation3] sm:$0xff] %vm65_vm0, %v824_v4 }
 0x9ce   :  { %v813_v3 = vsel %vm812_vm9, %v970_v57, %v809_v5 }
 0x9cf   :  { %v815_v6 = vmul.f32 %v813_v3, %v781_v42 }
 0x9d1   :  { %v820_v8 = vmul.f32 %v923_v60, %v815_v6 }
 0x9d3   :  { %v825_v9 = vadd.f32 %v924_v63, %v820_v8 }
 0x9d5   :  { %827 = vst.msk [vmem:[#allocation3 + $0x8] sm:$0xff] %vm65_vm0, %v825_v9 }
 0x9d6   :  { %840 = dma.vmem_to_hbm [thread:$0]  %s833_s1, 256, %s835_s21, [#allocation4], %s1013_s16, %s1013_s16, %s1009_s5  }
 0x9d7   :  { %995 = dma.done.wait [#allocation4], 256  }
 0x9d8   :  { %996 = vsyncadd [#allocation4], 4294967040 }
 0x9d9   :  { %845 = vsyncpa [#allocation4], 1 }

</bundles_post_ra>
